<compile_context>
chip_gen: v7x
topology: tpu7x:2x2x1
jax: 0.10.0
libtpu: 0.0.40
codegen_flags: <defaults>
</compile_context>

<pallas_src>
import functools
import math

import jax
import jax.numpy as jnp
from jax import lax
from jax.experimental import pallas as pl
from jax.experimental.pallas import tpu as pltpu

_LANES = 128      # vreg lane width
_SUBLANES = 8     # vreg sublane depth


def _cdiv(a, b):
    return -(-a // b)


def _round_up(a, b):
    return _cdiv(a, b) * b


def _block_config():
    """Returns (block_rows, vmem_limit_bytes), chosen per TPU generation.

    4096 rows x 128 lanes x 4 B = 2 MiB per f32 input block; 3 inputs double
    buffered = 12 MiB, safe on every generation once the scoped-VMEM limit is
    set explicitly.  On v6e / v7x (higher HBM bandwidth -> the ~0.35 us/step
    pipeline overhead matters more) use 8192-row (4 MiB) blocks.
    """
    block_rows = 4096
    vmem_limit = 32 << 20   # explicit: raises v5e's 16 MiB default scoped limit
    try:
        info = pltpu.get_tpu_info()
        parts = []
        for attr in ("chip_version", "name", "version"):
            val = getattr(info, attr, None)
            if val is not None:
                parts.append(str(val))
        name = " ".join(parts).lower()
        vmem = int(getattr(info, "vmem_capacity_bytes", 0) or 0)
        older_gen = any(tag in name for tag in ("v2", "v3", "v4", "v5"))
        if vmem >= (64 << 20) and not older_gen:
            block_rows = 8192          # 24 MiB of double-buffered f32 blocks
            vmem_limit = 32 << 20      # don't rely on default scoped limits
    except Exception:
        pass  # best-effort hardware query; conservative defaults are correct
    return block_rows, vmem_limit


def _abs_diff_sums_kernel(h_ref, l_ref, u_ref, out_ref, *,
                          rows, block_rows, steps_per_chunk, needs_mask):
    """Accumulate vector-shaped partial sums of |h-l|, |h-u|, |l-u|.

    Grid = (chunk, step):
      chunk -> "parallel"  (split across TensorCores on multi-TC parts)
      step  -> "arbitrary" (sequential accumulation into the resident block)

    out_ref: (1, 3, 8, 128) output block whose index_map is constant over the
    step axis, so it stays resident in VMEM and doubles as the accumulator.
    The tiny final cross-lane reduction happens in plain JAX.
    """
    c = pl.program_id(0)
    s = pl.program_id(1)

    @pl.when(s == 0)
    def _init():
        out_ref[...] = jnp.zeros_like(out_ref)

    # Native-dtype blocks come off the DMA; widen to f32 once for the VPU math
    # (v5e has no bf16 VALU) and keep the accumulation in f32.
    h = h_ref[...].astype(jnp.float32)
    l = l_ref[...].astype(jnp.float32)
    u = u_ref[...].astype(jnp.float32)

    d_hl = jnp.abs(h - l)
    d_hu = jnp.abs(h - u)
    d_lu = jnp.abs(l - u)

    def accumulate(a, b, c_):
        def psum(d):
            # (block_rows,128) -> (block_rows//8, 8, 128) is layout preserving;
            # summing over axis 0 is vreg-wise VPU adds - no XLU in the hot loop.
            return d.reshape(-1, _SUBLANES, _LANES).sum(axis=0)
        out_ref[0, 0] += psum(a)
        out_ref[0, 1] += psum(b)
        out_ref[0, 2] += psum(c_)

    if not needs_mask:
        # Common case: blocks exactly tile the (rows, 128) slab - no selects.
        accumulate(d_hl, d_hu, d_lu)
    else:
        block_start = (c * steps_per_chunk + s) * block_rows
        is_full = block_start + block_rows <= rows

        @pl.when(is_full)
        def _full():
            accumulate(d_hl, d_hu, d_lu)

        @pl.when(jnp.logical_not(is_full))
        def _tail():
            # Edge block: Pallas does NOT zero out-of-bounds rows of a partial
            # block, so mask them here (only this grid step pays the select).
            row_ids = lax.broadcasted_iota(jnp.int32, (block_rows, _LANES), 0)
            valid = (block_start + row_ids) < rows
            zero = jnp.float32(0.0)
            accumulate(jnp.where(valid, d_hl, zero),
                       jnp.where(valid, d_hu, zero),
                       jnp.where(valid, d_lu, zero))


def _pairwise_l1_means_pallas(h, l, u):
    total = math.prod(h.shape)

    # Keep the native dtype (no wrapper-side astype -> no materialized f32
    # copy; bf16 inputs halve the HBM bytes the kernel reads).
    hf = h.reshape(-1)
    lf = l.reshape(-1)
    uf = u.reshape(-1)

    rem = total % _LANES
    if rem:
        # Rare ragged-lane case: pad by < 128 elements so the lane-dense
        # reshape is legal.  Zero padding contributes |0 - 0| = 0.  The common
        # total % 128 == 0 case skips this copy entirely.
        pad = _LANES - rem
        hf = jnp.pad(hf, (0, pad))
        lf = jnp.pad(lf, (0, pad))
        uf = jnp.pad(uf, (0, pad))
    rows = hf.shape[0] // _LANES

    h2 = hf.reshape(rows, _LANES)
    l2 = lf.reshape(rows, _LANES)
    u2 = uf.reshape(rows, _LANES)

    cfg_block_rows, vmem_limit = _block_config()
    block_rows = min(cfg_block_rows, _round_up(rows, _SUBLANES))
    total_blocks = _cdiv(rows, block_rows)
    num_chunks = 2 if total_blocks >= 2 else 1     # feed both TCs on v7x
    steps_per_chunk = _cdiv(total_blocks, num_chunks)
    # The grid may over-cover the slab by at most one block plus a ragged last
    # block; those rows are masked inside the kernel (no jnp.pad of zeros).
    needs_mask = (num_chunks * steps_per_chunk * block_rows) != rows
    extra_blocks = num_chunks * steps_per_chunk - total_blocks   # 0 or 1

    kernel = functools.partial(
        _abs_diff_sums_kernel,
        rows=rows,
        block_rows=block_rows,
        steps_per_chunk=steps_per_chunk,
        needs_mask=needs_mask)

    if extra_blocks:
        def in_map(c, s):
            gb = c * steps_per_chunk + s
            # Clamp so the trailing "extra" grid point re-reads the last real
            # block; its contribution is fully masked to zero in the kernel.
            return (jnp.minimum(gb, total_blocks - 1), 0)
    else:
        def in_map(c, s):
            return (c * steps_per_chunk + s, 0)

    in_spec = pl.BlockSpec((block_rows, _LANES), in_map)
    out_spec = pl.BlockSpec((1, 3, _SUBLANES, _LANES), lambda c, s: (c, 0, 0, 0))

    out = pl.pallas_call(
        kernel,
        out_shape=jax.ShapeDtypeStruct(
            (num_chunks, 3, _SUBLANES, _LANES), jnp.float32),
        grid=(num_chunks, steps_per_chunk),
        in_specs=[in_spec, in_spec, in_spec],
        out_specs=out_spec,
        compiler_params=pltpu.CompilerParams(
            dimension_semantics=("parallel", "arbitrary"),
            vmem_limit_bytes=vmem_limit,
        ),
    )(h2, l2, u2)

    sums = jnp.sum(out, axis=(0, 2, 3))          # (chunks, 3, 8, 128) -> (3,)
    n = jnp.float32(total)
    return sums[0] / n, sums[1] / n, sums[2] / n


def _pairwise_l1_means(h, l, u, *, min_pallas_elements=1 << 20):
    """Returns (mean|h-l|, mean|h-u|, mean|l-u|)."""
    assert h.shape == l.shape == u.shape
    total = math.prod(h.shape)
    if total < min_pallas_elements:
        # Tiny tensors: custom-call + pipeline prologue would dominate;
        # XLA's fused reduction is at least as fast.
        def l1(a, b):
            return jnp.mean(jnp.abs(a.astype(jnp.float32) - b.astype(jnp.float32)))
        return l1(h, l), l1(h, u), l1(l, u)
    return _pairwise_l1_means_pallas(h, l, u)


@functools.partial(
    jax.jit,
    static_argnames=("spat_diff_loss_type", "fmri_dividing_type",
                     "min_pallas_elements"))
def spatial_difference_loss(h, l, u,
                            spat_diff_loss_type="minus_log",
                            fmri_dividing_type="three_channels",
                            min_pallas_elements=1 << 20):
    """JAX/Pallas equivalent of Spatial_Difference_Loss.forward."""
    l1_hl, l1_hu, l1_lu = _pairwise_l1_means(
        h, l, u, min_pallas_elements=min_pallas_elements)

    if spat_diff_loss_type == "minus_log":
        if fmri_dividing_type == "three_channels":
            return -jnp.log(l1_hl + l1_hu + l1_lu)
        elif fmri_dividing_type == "two_channels":
            return -jnp.log(l1_lu)
        else:
            raise ValueError("unknown fmri_dividing_type")
    elif spat_diff_loss_type == "reciprocal_log":
        return 1.0 / jnp.log(l1_hl + l1_hu + l1_lu)
    elif spat_diff_loss_type == "exp_minus":
        return jnp.exp(-l1_hl) + jnp.exp(-l1_hu) + jnp.exp(-l1_lu)
    elif spat_diff_loss_type == "log_loss":
        return (jnp.log(l1_hl) + jnp.log(l1_hu) + jnp.log(l1_lu)) / 3.0
    elif spat_diff_loss_type == "exp_whole":
        return jnp.exp(-1.0 * (l1_hl + l1_hu + l1_lu))
    else:
        raise ValueError("unknown spat_diff_loss_type")
    # TODO(synk): requires_grad_/retain_grad are PyTorch autograd bookkeeping
    # with no Pallas equivalent; JAX handles grads functionally via jax.grad.


if __name__ == "__main__":
    key = jax.random.PRNGKey(0)
    kh, kl, ku = jax.random.split(key, 3)

    batch, roi = 2, 16  # (batch, ROI, ROI) attention maps
    h = jax.random.normal(kh, (batch, roi, roi), dtype=jnp.float32)
    l = jax.random.normal(kl, (batch, roi, roi), dtype=jnp.float32)
    u = jax.random.normal(ku, (batch, roi, roi), dtype=jnp.float32)

    # min_pallas_elements=0 forces the Pallas path even at this tiny size so
    # the kernel itself is exercised (production default falls back to XLA
    # below ~1M elements).
    loss = spatial_difference_loss(
        h, l, u,
        spat_diff_loss_type="minus_log",
        fmri_dividing_type="three_channels",
        min_pallas_elements=0,
    )
    jax.block_until_ready(loss)

    # sanity check against a pure-JAX reference
    def ref_l1(a, b):
        return jnp.mean(jnp.abs(a - b))
    ref = -jnp.log(ref_l1(h, l) + ref_l1(h, u) + ref_l1(l, u))
    assert jnp.allclose(loss, ref, rtol=1e-5, atol=1e-5), (loss, ref)

    print("KERNEL_OK")
</pallas_src>

<mosaic_0001>
module attributes {stable_mosaic.version = 11 : i64} {
  func.func @_abs_diff_sums_kernel(%arg0: i32, %arg1: i32, %arg2: memref<8x128xf32, #tpu.memory_space<vmem>>, %arg3: memref<8x128xf32, #tpu.memory_space<vmem>>, %arg4: memref<8x128xf32, #tpu.memory_space<vmem>>, %arg5: memref<1x3x8x128xf32, #tpu.memory_space<vmem>>) attributes {dimension_semantics = [#tpu.dimension_semantics<parallel>, #tpu.dimension_semantics<arbitrary>], iteration_bounds = array<i64: 1, 1>, scalar_prefetch = 0 : i64, scratch_operands = 0 : i64, tpu.core_type = #tpu.core_type<tc>, window_params = [{transform_indices = @transform_0, window_bounds = array<i64: 8, 128>}, {transform_indices = @transform_1, window_bounds = array<i64: 8, 128>}, {transform_indices = @transform_2, window_bounds = array<i64: 8, 128>}, {transform_indices = @transform_3, window_bounds = array<i64: 1, 3, 8, 128>}]} {
    %c0_i32 = arith.constant 0 : i32
    %0 = arith.cmpi eq, %arg1, %c0_i32 : i32
    %1 = arith.extui %0 : i1 to i32
    %c0_i32_0 = arith.constant 0 : i32
    %2 = arith.cmpi ne, %1, %c0_i32_0 : i32
    scf.if %2 {
      %cst = arith.constant 0.000000e+00 : f32
      %22 = vector.broadcast %cst : f32 to vector<1x3x8x128xf32>
      %c0_9 = arith.constant 0 : index
      %c0_10 = arith.constant 0 : index
      %c0_11 = arith.constant 0 : index
      %c0_12 = arith.constant 0 : index
      %23 = vector.load %arg5[%c0_9, %c0_10, %c0_11, %c0_12] : memref<1x3x8x128xf32, #tpu.memory_space<vmem>>, vector<1x3x8x128xf32>
      tpu.vector_store %arg5[%c0_9, %c0_10, %c0_11, %c0_12], %22 {strides = array<i32>} : memref<1x3x8x128xf32, #tpu.memory_space<vmem>>, vector<1x3x8x128xf32>,
    } else {
    }
    %c0 = arith.constant 0 : index
    %c0_1 = arith.constant 0 : index
    %3 = vector.load %arg2[%c0, %c0_1] : memref<8x128xf32, #tpu.memory_space<vmem>>, vector<8x128xf32>
    %c0_2 = arith.constant 0 : index
    %c0_3 = arith.constant 0 : index
    %4 = vector.load %arg3[%c0_2, %c0_3] : memref<8x128xf32, #tpu.memory_space<vmem>>, vector<8x128xf32>
    %c0_4 = arith.constant 0 : index
    %c0_5 = arith.constant 0 : index
    %5 = vector.load %arg4[%c0_4, %c0_5] : memref<8x128xf32, #tpu.memory_space<vmem>>, vector<8x128xf32>
    %6 = arith.subf %3, %4 : vector<8x128xf32>
    %7 = math.absf %6 : vector<8x128xf32>
    %8 = arith.subf %3, %5 : vector<8x128xf32>
    %9 = math.absf %8 : vector<8x128xf32>
    %10 = arith.subf %4, %5 : vector<8x128xf32>
    %11 = math.absf %10 : vector<8x128xf32>
    %c1_i32 = arith.constant 1 : i32
    %12 = arith.muli %arg0, %c1_i32 : i32
    %13 = arith.addi %12, %arg1 : i32
    %c8_i32 = arith.constant 8 : i32
    %14 = arith.muli %13, %c8_i32 : i32
    %c8_i32_6 = arith.constant 8 : i32
    %15 = arith.addi %14, %c8_i32_6 : i32
    %c4_i32 = arith.constant 4 : i32
    %16 = arith.cmpi sle, %15, %c4_i32 : i32
    %17 = arith.extui %16 : i1 to i32
    %c0_i32_7 = arith.constant 0 : i32
    %18 = arith.cmpi ne, %17, %c0_i32_7 : i32
    scf.if %18 {
      %c0_9 = arith.constant 0 : index
      %c0_10 = arith.constant 0 : index
      %c0_11 = arith.constant 0 : index
      %c0_12 = arith.constant 0 : index
      %22 = vector.load %arg5[%c0_9, %c0_10, %c0_11, %c0_12] : memref<1x3x8x128xf32, #tpu.memory_space<vmem>>, vector<1x1x8x128xf32>
      %23 = vector.shape_cast %22 : vector<1x1x8x128xf32> to vector<8x128xf32>
      %24 = vector.shape_cast %7 : vector<8x128xf32> to vector<1x8x128xf32>
      %cst = arith.constant dense<0.000000e+00> : vector<8x128xf32>
      %25 = vector.multi_reduction <add>, %24, %cst [0] : vector<1x8x128xf32> to vector<8x128xf32>
      %26 = arith.addf %23, %25 : vector<8x128xf32>
      %c0_13 = arith.constant 0 : index
      %c0_14 = arith.constant 0 : index
      %c0_15 = arith.constant 0 : index
      %c0_16 = arith.constant 0 : index
      %27 = vector.load %arg5[%c0_13, %c0_14, %c0_15, %c0_16] : memref<1x3x8x128xf32, #tpu.memory_space<vmem>>, vector<1x1x8x128xf32>
      %28 = vector.shape_cast %27 : vector<1x1x8x128xf32> to vector<8x128xf32>
      %29 = vector.shape_cast %26 : vector<8x128xf32> to vector<1x1x8x128xf32>
      tpu.vector_store %arg5[%c0_13, %c0_14, %c0_15, %c0_16], %29 {strides = array<i32>} : memref<1x3x8x128xf32, #tpu.memory_space<vmem>>, vector<1x1x8x128xf32>,
      %c0_17 = arith.constant 0 : index
      %c1 = arith.constant 1 : index
      %c0_18 = arith.constant 0 : index
      %c0_19 = arith.constant 0 : index
      %30 = vector.load %arg5[%c0_17, %c1, %c0_18, %c0_19] : memref<1x3x8x128xf32, #tpu.memory_space<vmem>>, vector<1x1x8x128xf32>
      %31 = vector.shape_cast %30 : vector<1x1x8x128xf32> to vector<8x128xf32>
      %32 = vector.shape_cast %9 : vector<8x128xf32> to vector<1x8x128xf32>
      %cst_20 = arith.constant dense<0.000000e+00> : vector<8x128xf32>
      %33 = vector.multi_reduction <add>, %32, %cst_20 [0] : vector<1x8x128xf32> to vector<8x128xf32>
      %34 = arith.addf %31, %33 : vector<8x128xf32>
      %c0_21 = arith.constant 0 : index
      %c1_22 = arith.constant 1 : index
      %c0_23 = arith.constant 0 : index
      %c0_24 = arith.constant 0 : index
      %35 = vector.load %arg5[%c0_21, %c1_22, %c0_23, %c0_24] : memref<1x3x8x128xf32, #tpu.memory_space<vmem>>, vector<1x1x8x128xf32>
      %36 = vector.shape_cast %35 : vector<1x1x8x128xf32> to vector<8x128xf32>
      %37 = vector.shape_cast %34 : vector<8x128xf32> to vector<1x1x8x128xf32>
      tpu.vector_store %arg5[%c0_21, %c1_22, %c0_23, %c0_24], %37 {strides = array<i32>} : memref<1x3x8x128xf32, #tpu.memory_space<vmem>>, vector<1x1x8x128xf32>,
      %c0_25 = arith.constant 0 : index
      %c2 = arith.constant 2 : index
      %c0_26 = arith.constant 0 : index
      %c0_27 = arith.constant 0 : index
      %38 = vector.load %arg5[%c0_25, %c2, %c0_26, %c0_27] : memref<1x3x8x128xf32, #tpu.memory_space<vmem>>, vector<1x1x8x128xf32>
      %39 = vector.shape_cast %38 : vector<1x1x8x128xf32> to vector<8x128xf32>
      %40 = vector.shape_cast %11 : vector<8x128xf32> to vector<1x8x128xf32>
      %cst_28 = arith.constant dense<0.000000e+00> : vector<8x128xf32>
      %41 = vector.multi_reduction <add>, %40, %cst_28 [0] : vector<1x8x128xf32> to vector<8x128xf32>
      %42 = arith.addf %39, %41 : vector<8x128xf32>
      %c0_29 = arith.constant 0 : index
      %c2_30 = arith.constant 2 : index
      %c0_31 = arith.constant 0 : index
      %c0_32 = arith.constant 0 : index
      %43 = vector.load %arg5[%c0_29, %c2_30, %c0_31, %c0_32] : memref<1x3x8x128xf32, #tpu.memory_space<vmem>>, vector<1x1x8x128xf32>
      %44 = vector.shape_cast %43 : vector<1x1x8x128xf32> to vector<8x128xf32>
      %45 = vector.shape_cast %42 : vector<8x128xf32> to vector<1x1x8x128xf32>
      tpu.vector_store %arg5[%c0_29, %c2_30, %c0_31, %c0_32], %45 {strides = array<i32>} : memref<1x3x8x128xf32, #tpu.memory_space<vmem>>, vector<1x1x8x128xf32>,
    } else {
    }
    %true = arith.constant true
    %19 = arith.xori %16, %true : i1
    %20 = arith.extui %19 : i1 to i32
    %c0_i32_8 = arith.constant 0 : i32
    %21 = arith.cmpi ne, %20, %c0_i32_8 : i32
    scf.if %21 {
      %22 = tpu.iota {dimensions = array<i32: 0>} : vector<8x128xi32>
      %23 = vector.broadcast %14 : i32 to vector<8x128xi32>
      %24 = arith.addi %23, %22 : vector<8x128xi32>
      %c4_i32_9 = arith.constant 4 : i32
      %25 = vector.broadcast %c4_i32_9 : i32 to vector<8x128xi32>
      %26 = arith.cmpi slt, %24, %25 : vector<8x128xi32>
      %cst = arith.constant 0.000000e+00 : f32
      %27 = vector.broadcast %cst : f32 to vector<8x128xf32>
      %28 = arith.select %26, %7, %27 : vector<8x128xi1>, vector<8x128xf32>
      %cst_10 = arith.constant 0.000000e+00 : f32
      %29 = vector.broadcast %cst_10 : f32 to vector<8x128xf32>
      %30 = arith.select %26, %9, %29 : vector<8x128xi1>, vector<8x128xf32>
      %cst_11 = arith.constant 0.000000e+00 : f32
      %31 = vector.broadcast %cst_11 : f32 to vector<8x128xf32>
      %32 = arith.select %26, %11, %31 : vector<8x128xi1>, vector<8x128xf32>
      %c0_12 = arith.constant 0 : index
      %c0_13 = arith.constant 0 : index
      %c0_14 = arith.constant 0 : index
      %c0_15 = arith.constant 0 : index
      %33 = vector.load %arg5[%c0_12, %c0_13, %c0_14, %c0_15] : memref<1x3x8x128xf32, #tpu.memory_space<vmem>>, vector<1x1x8x128xf32>
      %34 = vector.shape_cast %33 : vector<1x1x8x128xf32> to vector<8x128xf32>
      %35 = vector.shape_cast %28 : vector<8x128xf32> to vector<1x8x128xf32>
      %cst_16 = arith.constant dense<0.000000e+00> : vector<8x128xf32>
      %36 = vector.multi_reduction <add>, %35, %cst_16 [0] : vector<1x8x128xf32> to vector<8x128xf32>
      %37 = arith.addf %34, %36 : vector<8x128xf32>
      %c0_17 = arith.constant 0 : index
      %c0_18 = arith.constant 0 : index
      %c0_19 = arith.constant 0 : index
      %c0_20 = arith.constant 0 : index
      %38 = vector.load %arg5[%c0_17, %c0_18, %c0_19, %c0_20] : memref<1x3x8x128xf32, #tpu.memory_space<vmem>>, vector<1x1x8x128xf32>
      %39 = vector.shape_cast %38 : vector<1x1x8x128xf32> to vector<8x128xf32>
      %40 = vector.shape_cast %37 : vector<8x128xf32> to vector<1x1x8x128xf32>
      tpu.vector_store %arg5[%c0_17, %c0_18, %c0_19, %c0_20], %40 {strides = array<i32>} : memref<1x3x8x128xf32, #tpu.memory_space<vmem>>, vector<1x1x8x128xf32>,
      %c0_21 = arith.constant 0 : index
      %c1 = arith.constant 1 : index
      %c0_22 = arith.constant 0 : index
      %c0_23 = arith.constant 0 : index
      %41 = vector.load %arg5[%c0_21, %c1, %c0_22, %c0_23] : memref<1x3x8x128xf32, #tpu.memory_space<vmem>>, vector<1x1x8x128xf32>
      %42 = vector.shape_cast %41 : vector<1x1x8x128xf32> to vector<8x128xf32>
      %43 = vector.shape_cast %30 : vector<8x128xf32> to vector<1x8x128xf32>
      %cst_24 = arith.constant dense<0.000000e+00> : vector<8x128xf32>
      %44 = vector.multi_reduction <add>, %43, %cst_24 [0] : vector<1x8x128xf32> to vector<8x128xf32>
      %45 = arith.addf %42, %44 : vector<8x128xf32>
      %c0_25 = arith.constant 0 : index
      %c1_26 = arith.constant 1 : index
      %c0_27 = arith.constant 0 : index
      %c0_28 = arith.constant 0 : index
      %46 = vector.load %arg5[%c0_25, %c1_26, %c0_27, %c0_28] : memref<1x3x8x128xf32, #tpu.memory_space<vmem>>, vector<1x1x8x128xf32>
      %47 = vector.shape_cast %46 : vector<1x1x8x128xf32> to vector<8x128xf32>
      %48 = vector.shape_cast %45 : vector<8x128xf32> to vector<1x1x8x128xf32>
      tpu.vector_store %arg5[%c0_25, %c1_26, %c0_27, %c0_28], %48 {strides = array<i32>} : memref<1x3x8x128xf32, #tpu.memory_space<vmem>>, vector<1x1x8x128xf32>,
      %c0_29 = arith.constant 0 : index
      %c2 = arith.constant 2 : index
      %c0_30 = arith.constant 0 : index
      %c0_31 = arith.constant 0 : index
      %49 = vector.load %arg5[%c0_29, %c2, %c0_30, %c0_31] : memref<1x3x8x128xf32, #tpu.memory_space<vmem>>, vector<1x1x8x128xf32>
      %50 = vector.shape_cast %49 : vector<1x1x8x128xf32> to vector<8x128xf32>
      %51 = vector.shape_cast %32 : vector<8x128xf32> to vector<1x8x128xf32>
      %cst_32 = arith.constant dense<0.000000e+00> : vector<8x128xf32>
      %52 = vector.multi_reduction <add>, %51, %cst_32 [0] : vector<1x8x128xf32> to vector<8x128xf32>
      %53 = arith.addf %50, %52 : vector<8x128xf32>
      %c0_33 = arith.constant 0 : index
      %c2_34 = arith.constant 2 : index
      %c0_35 = arith.constant 0 : index
      %c0_36 = arith.constant 0 : index
      %54 = vector.load %arg5[%c0_33, %c2_34, %c0_35, %c0_36] : memref<1x3x8x128xf32, #tpu.memory_space<vmem>>, vector<1x1x8x128xf32>
      %55 = vector.shape_cast %54 : vector<1x1x8x128xf32> to vector<8x128xf32>
      %56 = vector.shape_cast %53 : vector<8x128xf32> to vector<1x1x8x128xf32>
      tpu.vector_store %arg5[%c0_33, %c2_34, %c0_35, %c0_36], %56 {strides = array<i32>} : memref<1x3x8x128xf32, #tpu.memory_space<vmem>>, vector<1x1x8x128xf32>,
    } else {
    }
    return
  }
  func.func @transform_0(%arg0: i32, %arg1: i32) -> (i32, i32) {
    %c1_i32 = arith.constant 1 : i32
    %0 = arith.muli %arg0, %c1_i32 : i32
    %1 = arith.addi %0, %arg1 : i32
    %c0_i32 = arith.constant 0 : i32
    %c0_i32_0 = arith.constant 0 : i32
    return %1, %c0_i32 : i32, i32
  }
  func.func @transform_1(%arg0: i32, %arg1: i32) -> (i32, i32) {
    %c1_i32 = arith.constant 1 : i32
    %0 = arith.muli %arg0, %c1_i32 : i32
    %1 = arith.addi %0, %arg1 : i32
    %c0_i32 = arith.constant 0 : i32
    %c0_i32_0 = arith.constant 0 : i32
    return %1, %c0_i32 : i32, i32
  }
  func.func @transform_2(%arg0: i32, %arg1: i32) -> (i32, i32) {
    %c1_i32 = arith.constant 1 : i32
    %0 = arith.muli %arg0, %c1_i32 : i32
    %1 = arith.addi %0, %arg1 : i32
    %c0_i32 = arith.constant 0 : i32
    %c0_i32_0 = arith.constant 0 : i32
    return %1, %c0_i32 : i32, i32
  }
  func.func @transform_3(%arg0: i32, %arg1: i32) -> (i32, i32, i32, i32) {
    %c0_i32 = arith.constant 0 : i32
    %c0_i32_0 = arith.constant 0 : i32
    %c0_i32_1 = arith.constant 0 : i32
    %c0_i32_2 = arith.constant 0 : i32
    return %arg0, %c0_i32, %c0_i32_0, %c0_i32_1 : i32, i32, i32, i32
  }
}

</mosaic_0001>

<bundles_post_ra>
// kernel: spatial_difference_loss.1
= control target key start
LH: loop header
LB: loop body
LE: loop exit
PB: predicated region body
PF: predicated region fallthrough
CT: control target
= control target key end

     0   :  { %v151_v0 = vlaneseq  ;;  %s242_s0 = inlined_call_operand.vmem [shape: f32[4,128], index: 0, kind: input, shape index: {}]   ;;  %s243_s1 = inlined_call_operand.vmem [shape: f32[4,128], index: 1, kind: input, shape index: {}]   ;;  %s244_s2 = inlined_call_operand.vmem [shape: f32[4,128], index: 2, kind: input, shape index: {}]   ;;  %s245_s3 = inlined_call_operand.vmem [shape: f32[1,3,8,128], index: 3, kind: output, shape index: {}]  }
   0x1   :  { %v117_v1 = vld [vmem:[%s242_s0] sm:$0xff] }
   0x2   :  { %v118_v2 = vld [vmem:[%s243_s1] sm:$0xff]  ;;  %v152_v5 = vshrl.u32 %v151_v0, 7 }
   0x3   :  { %v119_v3 = vld [vmem:[%s244_s2] sm:$0xff]  ;;  %v120_v4 = vsub.f32 %v117_v1, %v118_v2 }
   0x4   :  { %v122_v6 = vsub.f32 %v117_v1, %v119_v3  ;;  %v124_v7 = vsub.f32 %v118_v2, %v119_v3  ;;  %vm155_vm0 = vcmp.lt.s32.totalorder %v152_v5, 4 }
   0x5   :  { %v121_v8 = vand.u32 2147483647, %v120_v4 }
   0x6   :  { %v123_v9 = vand.u32 2147483647, %v122_v6  ;;  %v125_v10 = vand.u32 2147483647, %v124_v7 }
   0x7   :  { %v156_v11 = vsel %vm155_vm0, %v121_v8, 0.0 }
   0x8   :  { %v157_v12 = vsel %vm155_vm0, %v123_v9, 0.0  ;;  %v158_v13 = vsel %vm155_vm0, %v125_v10, 0.0  ;;  %162 = vst [vmem:[%s245_s3] sm:$0xff] %v156_v11 }
   0x9   :  { %200 = vst [vmem:[%s245_s3 + $0x8] sm:$0xff] %v157_v12  ;;  %202 = vst [vmem:[%s245_s3 + $0x10] sm:$0xff] %v158_v13 }

</bundles_post_ra>
